<compile_context>
chip_gen: v7x
topology: tpu7x:2x2x1
jax: 0.10.0
libtpu: 0.0.40
codegen_flags: <defaults>
</compile_context>

<pallas_src>
import functools

import jax
import jax.numpy as jnp
from jax.experimental import pallas as pl
from jax.experimental.pallas import tpu as pltpu

EPS = 1e-5
LANE = 128     # TPU lane width: feature dims padded to a multiple of this
SUBLANE = 8    # f32 sublane width: batch tiles are multiples of this


def _round_up(n, m):
    return ((n + m - 1) // m) * m


def _cdiv(a, b):
    return -(-a // b)


def _pad2(a, shape):
    return jnp.pad(a, [(0, s - d) for d, s in zip(a.shape, shape)])


def make_actor_kernel(h_true, hp, ap, eps):
    """h_true: real hidden size; hp/ap: lane-padded hidden / action widths."""
    inv_h = 1.0 / h_true
    inv_hm1 = 1.0 / (h_true - 1)   # unbiased std (ddof=1), as in torch .std()

    def layernorm(h, gamma, beta, mask):
        # Padded lanes of `h` are exactly zero (zero-padded weight cols / biases),
        # so a full-width sum equals the sum over the true features.
        mean = jnp.sum(h, axis=-1, keepdims=True) * inv_h
        centered = h - mean
        # Padded lanes of `centered` are -mean; the precomputed 0/1 float mask
        # (row 7 of the packed params) keeps them out of the sum of squares.
        sq = centered * centered * mask
        var = jnp.sum(sq, axis=-1, keepdims=True) * inv_hm1
        std = jnp.sqrt(var)
        # eps added to std (not variance) -- matches the custom PyTorch LayerNorm.
        y = centered * pl.reciprocal(std + eps, approx=False)
        # gamma/beta are zero in the padded lanes -> padded lanes return to 0.
        return gamma * y + beta

    def actor_kernel(x_ref, w1_ref, w2_ref, wmu_ref, p_ref, out_ref):
        x = x_ref[...]
        p = p_ref[...]

        # Packed per-feature params: rows = b1, g1, be1, b2, g2, be2, bmu, mask.
        b1, g1, be1 = p[0:1, :hp], p[1:2, :hp], p[2:3, :hp]
        b2, g2, be2 = p[3:4, :hp], p[4:5, :hp], p[5:6, :hp]
        bmu = p[6:7, :ap]
        mask = p[7:8, :hp]

        mm_dtype = w1_ref.dtype  # bf16 when use_bf16, else f32; always f32 acc.

        # linear1 + LN1 + relu
        h = jnp.dot(x, w1_ref[...], preferred_element_type=jnp.float32) + b1
        h = jnp.maximum(layernorm(h, g1, be1, mask), 0.0)

        # linear2 + LN2 + relu
        h = jnp.dot(h.astype(mm_dtype), w2_ref[...],
                    preferred_element_type=jnp.float32) + b2
        h = jnp.maximum(layernorm(h, g2, be2, mask), 0.0)

        # mu head + tanh (lane-dense padded output; wrapper slices real actions)
        mu = jnp.dot(h.astype(mm_dtype), wmu_ref[...],
                     preferred_element_type=jnp.float32) + bmu
        out_ref[...] = jnp.tanh(mu)

    return actor_kernel


@functools.partial(jax.jit, static_argnames=("tile_b", "use_bf16"))
def actor_forward(x, params, *, tile_b=2048, use_bf16=False):
    (w1, b1, g1, be1, w2, b2, g2, be2, wmu, bmu) = params
    B, d_in = x.shape
    H = w1.shape[1]
    A = wmu.shape[1]
    assert H > 1, "hidden_size must be > 1 (unbiased std divides by H-1)"

    d_in_p = _round_up(d_in, LANE)
    hp = _round_up(H, LANE)
    ap = _round_up(A, LANE)
    pw = max(hp, ap)                 # packed per-feature parameter width

    mm_dtype = jnp.bfloat16 if use_bf16 else jnp.float32
    w_itemsize = jnp.dtype(mm_dtype).itemsize

    # --- Batch tile selection -------------------------------------------------
    # Balanced tiles (avoid a mostly-zero last tile), at least 2 grid steps when
    # the batch allows it (so v7x's two TensorCores both get work; the extra
    # ~0.35us step is noise on v5e/v6e), multiple of the 8-row sublane.
    num_tiles = max(1, _cdiv(B, max(tile_b, SUBLANE)))
    if B > SUBLANE:
        num_tiles = max(num_tiles, 2)
    tb = _round_up(_cdiv(B, num_tiles), SUBLANE)

    # Cap tb against an explicit VMEM budget (portable to v7x's 64 MiB physical /
    # 32 MiB scoped default): single-buffered weights + double-buffered io blocks
    # + generous headroom for the f32 (tb, hp) intermediates inside the kernel.
    weight_bytes = w_itemsize * (d_in_p * hp + hp * hp + hp * ap) + 4 * 8 * pw
    per_row_bytes = 2 * w_itemsize * d_in_p + 2 * 4 * ap + 6 * 4 * hp
    budget = (40 << 20) - weight_bytes
    tb_cap = max(SUBLANE, (budget // per_row_bytes) // SUBLANE * SUBLANE)
    tb = min(tb, tb_cap)
    bp = _round_up(B, tb)

    vmem_limit = weight_bytes + tb * per_row_bytes + (4 << 20)
    vmem_limit = int(min(max(vmem_limit, 32 << 20), 64 << 20))

    # --- Padding / packing (padding never changes the math: padded weight
    # rows/cols, biases, gamma, beta and mask lanes are zero) -------------------
    x_p = _pad2(x, (bp, d_in_p)).astype(mm_dtype)
    w1_p = _pad2(w1, (d_in_p, hp)).astype(mm_dtype)
    w2_p = _pad2(w2, (hp, hp)).astype(mm_dtype)
    wmu_p = _pad2(wmu, (hp, ap)).astype(mm_dtype)

    # Pack the seven (1, feat) vectors + the 0/1 LN mask into ONE (8, pw) tensor
    # -> one DMA descriptor instead of eight, and no per-step iota/compare.
    packed = jnp.zeros((8, pw), jnp.float32)
    for r, v in enumerate((b1, g1, be1, b2, g2, be2, bmu)):
        packed = packed.at[r, : v.shape[-1]].set(v.reshape(-1).astype(jnp.float32))
    packed = packed.at[7, :H].set(1.0)   # LN feature mask

    kernel = make_actor_kernel(H, hp, ap, EPS)

    # Constant-index operands: single-buffered (double-buffering a never-changing
    # block only wastes VMEM). Activations/output keep default pipelining.
    resident = dict(pipeline_mode=pl.Buffered(1))

    out = pl.pallas_call(
        kernel,
        out_shape=jax.ShapeDtypeStruct((bp, ap), jnp.float32),
        grid=(bp // tb,),
        in_specs=[
            pl.BlockSpec((tb, d_in_p), lambda i: (i, 0)),            # x: tiled over batch
            pl.BlockSpec((d_in_p, hp), lambda i: (0, 0), **resident),  # W1: VMEM-resident
            pl.BlockSpec((hp, hp), lambda i: (0, 0), **resident),      # W2: VMEM-resident
            pl.BlockSpec((hp, ap), lambda i: (0, 0), **resident),      # Wmu: VMEM-resident
            pl.BlockSpec((8, pw), lambda i: (0, 0), **resident),       # packed b/g/beta/mask
        ],
        out_specs=pl.BlockSpec((tb, ap), lambda i: (i, 0)),
        compiler_params=pltpu.CompilerParams(
            dimension_semantics=("parallel",),
            vmem_limit_bytes=vmem_limit),
    )(x_p, w1_p, w2_p, wmu_p, packed)

    return out[:B, :A]


def init_actor_params(key, num_inputs, hidden_size, num_outputs):
    """Synthetic init mimicking the PyTorch module.

    nn.Linear default init ~ U(-1/sqrt(fan_in), 1/sqrt(fan_in)); LayerNorm gamma
    ~ U(0,1), beta = 0; mu head weights/bias scaled by 0.1. Weights are stored
    transposed: (in_features, out_features).
    """
    ks = jax.random.split(key, 8)

    def lin(kw, kb, fan_in, fan_out):
        bound = 1.0 / jnp.sqrt(fan_in)
        w = jax.random.uniform(kw, (fan_in, fan_out), jnp.float32, -bound, bound)
        b = jax.random.uniform(kb, (1, fan_out), jnp.float32, -bound, bound)
        return w, b

    w1, b1 = lin(ks[0], ks[1], num_inputs, hidden_size)
    w2, b2 = lin(ks[2], ks[3], hidden_size, hidden_size)
    wmu, bmu = lin(ks[4], ks[5], hidden_size, num_outputs)
    wmu = wmu * 0.1
    bmu = bmu * 0.1

    g1 = jax.random.uniform(ks[6], (1, hidden_size), jnp.float32, 0.0, 1.0)
    be1 = jnp.zeros((1, hidden_size), jnp.float32)
    g2 = jax.random.uniform(ks[7], (1, hidden_size), jnp.float32, 0.0, 1.0)
    be2 = jnp.zeros((1, hidden_size), jnp.float32)

    return (w1, b1, g1, be1, w2, b2, g2, be2, wmu, bmu)


def _layernorm_torchstyle(h, gamma, beta, eps, num_features):
    mean = jnp.mean(h, axis=-1, keepdims=True)
    centered = h - mean
    var = jnp.sum(centered * centered, axis=-1, keepdims=True) / (num_features - 1)
    std = jnp.sqrt(var)
    return gamma * (centered / (std + eps)) + beta


def actor_forward_ref(x, params):
    """Pure-JAX reference for correctness checking (unpadded)."""
    (w1, b1, g1, be1, w2, b2, g2, be2, wmu, bmu) = params
    H = w1.shape[1]
    h = x @ w1 + b1
    h = jnp.maximum(_layernorm_torchstyle(h, g1, be1, EPS, H), 0.0)
    h = h @ w2 + b2
    h = jnp.maximum(_layernorm_torchstyle(h, g2, be2, EPS, H), 0.0)
    return jnp.tanh(h @ wmu + bmu)


if __name__ == "__main__":
    key = jax.random.PRNGKey(0)
    k_in, k_par = jax.random.split(key)

    batch = 16
    num_inputs = 16
    hidden_size = 32
    num_outputs = 4  # action_space.shape[0]

    x = jax.random.normal(k_in, (batch, num_inputs), jnp.float32)
    params = init_actor_params(k_par, num_inputs, hidden_size, num_outputs)
    ref = actor_forward_ref(x, params)

    # Default path: balanced tiles, grid forced to >=2 steps (v7x megacore).
    out = jax.block_until_ready(actor_forward(x, params))
    assert out.shape == (batch, num_outputs)
    assert jnp.allclose(out, ref, atol=2e-5, rtol=1e-5), float(jnp.max(jnp.abs(out - ref)))

    # Small explicit tile: exercises a multi-step batch grid with VMEM-resident,
    # single-buffered weights.
    out2 = jax.block_until_ready(actor_forward(x, params, tile_b=8))
    assert jnp.allclose(out2, ref, atol=2e-5, rtol=1e-5), float(jnp.max(jnp.abs(out2 - ref)))

    print("KERNEL_OK")
</pallas_src>

<mosaic_0001>
module attributes {stable_mosaic.version = 11 : i64} {
  func.func @actor_kernel(%arg0: i32, %arg1: memref<8x128xf32, #tpu.memory_space<vmem>>, %arg2: memref<128x128xf32, #tpu.memory_space<vmem>>, %arg3: memref<128x128xf32, #tpu.memory_space<vmem>>, %arg4: memref<128x128xf32, #tpu.memory_space<vmem>>, %arg5: memref<8x128xf32, #tpu.memory_space<vmem>>, %arg6: memref<8x128xf32, #tpu.memory_space<vmem>>) attributes {dimension_semantics = [#tpu.dimension_semantics<parallel>], iteration_bounds = array<i64: 2>, scalar_prefetch = 0 : i64, scratch_operands = 0 : i64, tpu.core_type = #tpu.core_type<tc>, window_params = [{transform_indices = @transform_0, window_bounds = array<i64: 8, 128>}, {pipeline_mode = #tpu.pipeline_mode<synchronous>, transform_indices = @transform_1, window_bounds = array<i64: 128, 128>}, {pipeline_mode = #tpu.pipeline_mode<synchronous>, transform_indices = @transform_2, window_bounds = array<i64: 128, 128>}, {pipeline_mode = #tpu.pipeline_mode<synchronous>, transform_indices = @transform_3, window_bounds = array<i64: 128, 128>}, {pipeline_mode = #tpu.pipeline_mode<synchronous>, transform_indices = @transform_4, window_bounds = array<i64: 8, 128>}, {transform_indices = @transform_5, window_bounds = array<i64: 8, 128>}]} {
    %c0 = arith.constant 0 : index
    %c0_0 = arith.constant 0 : index
    %0 = vector.load %arg1[%c0, %c0_0] : memref<8x128xf32, #tpu.memory_space<vmem>>, vector<8x128xf32>
    %c0_1 = arith.constant 0 : index
    %c0_2 = arith.constant 0 : index
    %1 = vector.load %arg5[%c0_1, %c0_2] : memref<8x128xf32, #tpu.memory_space<vmem>>, vector<8x128xf32>
    %2 = vector.extract_strided_slice %1 {offsets = [0, 0], sizes = [1, 128], strides = [1, 1]} : vector<8x128xf32> to vector<1x128xf32>
    %3 = vector.extract_strided_slice %1 {offsets = [1, 0], sizes = [1, 128], strides = [1, 1]} : vector<8x128xf32> to vector<1x128xf32>
    %4 = vector.extract_strided_slice %1 {offsets = [2, 0], sizes = [1, 128], strides = [1, 1]} : vector<8x128xf32> to vector<1x128xf32>
    %5 = vector.extract_strided_slice %1 {offsets = [3, 0], sizes = [1, 128], strides = [1, 1]} : vector<8x128xf32> to vector<1x128xf32>
    %6 = vector.extract_strided_slice %1 {offsets = [4, 0], sizes = [1, 128], strides = [1, 1]} : vector<8x128xf32> to vector<1x128xf32>
    %7 = vector.extract_strided_slice %1 {offsets = [5, 0], sizes = [1, 128], strides = [1, 1]} : vector<8x128xf32> to vector<1x128xf32>
    %8 = vector.extract_strided_slice %1 {offsets = [6, 0], sizes = [1, 128], strides = [1, 1]} : vector<8x128xf32> to vector<1x128xf32>
    %9 = vector.extract_strided_slice %1 {offsets = [7, 0], sizes = [1, 128], strides = [1, 1]} : vector<8x128xf32> to vector<1x128xf32>
    %c0_3 = arith.constant 0 : index
    %c0_4 = arith.constant 0 : index
    %10 = vector.load %arg2[%c0_3, %c0_4] : memref<128x128xf32, #tpu.memory_space<vmem>>, vector<128x128xf32>
    %cst = arith.constant dense<0.000000e+00> : vector<8x128xf32>
    %11 = tpu.matmul %0, %10, %cst {dimension_numbers = #tpu.dot_dimension_numbers<[1], [0], [0], [1], [0, 0, 1, 1], [], []>} : vector<8x128xf32>, vector<128x128xf32>, vector<8x128xf32> -> vector<8x128xf32>
    %12 = vector.broadcast %2 : vector<1x128xf32> to vector<8x128xf32>
    %13 = arith.addf %11, %12 : vector<8x128xf32>
    %cst_5 = arith.constant dense<0.000000e+00> : vector<8xf32>
    %14 = vector.multi_reduction <add>, %13, %cst_5 [1] : vector<8x128xf32> to vector<8xf32>
    %15 = vector.shape_cast %14 : vector<8xf32> to vector<8x1xf32>
    %cst_6 = arith.constant 3.125000e-02 : f32
    %16 = vector.broadcast %cst_6 : f32 to vector<8x1xf32>
    %17 = arith.mulf %15, %16 : vector<8x1xf32>
    %18 = vector.broadcast %17 : vector<8x1xf32> to vector<8x128xf32>
    %19 = arith.subf %13, %18 : vector<8x128xf32>
    %20 = arith.mulf %19, %19 : vector<8x128xf32>
    %21 = vector.broadcast %9 : vector<1x128xf32> to vector<8x128xf32>
    %22 = arith.mulf %20, %21 : vector<8x128xf32>
    %cst_7 = arith.constant dense<0.000000e+00> : vector<8xf32>
    %23 = vector.multi_reduction <add>, %22, %cst_7 [1] : vector<8x128xf32> to vector<8xf32>
    %24 = vector.shape_cast %23 : vector<8xf32> to vector<8x1xf32>
    %cst_8 = arith.constant 0.0322580636 : f32
    %25 = vector.broadcast %cst_8 : f32 to vector<8x1xf32>
    %26 = arith.mulf %24, %25 : vector<8x1xf32>
    %27 = math.sqrt %26 : vector<8x1xf32>
    %cst_9 = arith.constant 9.99999974E-6 : f32
    %28 = vector.broadcast %cst_9 : f32 to vector<8x1xf32>
    %29 = arith.addf %27, %28 : vector<8x1xf32>
    %30 = tpu.reciprocal %29 : vector<8x1xf32> -> vector<8x1xf32>
    %31 = vector.broadcast %30 : vector<8x1xf32> to vector<8x128xf32>
    %32 = arith.mulf %19, %31 : vector<8x128xf32>
    %33 = vector.broadcast %3 : vector<1x128xf32> to vector<8x128xf32>
    %34 = arith.mulf %33, %32 : vector<8x128xf32>
    %35 = vector.broadcast %4 : vector<1x128xf32> to vector<8x128xf32>
    %36 = arith.addf %34, %35 : vector<8x128xf32>
    %cst_10 = arith.constant 0.000000e+00 : f32
    %37 = vector.broadcast %cst_10 : f32 to vector<8x128xf32>
    %38 = arith.maximumf %36, %37 : vector<8x128xf32>
    %c0_11 = arith.constant 0 : index
    %c0_12 = arith.constant 0 : index
    %39 = vector.load %arg3[%c0_11, %c0_12] : memref<128x128xf32, #tpu.memory_space<vmem>>, vector<128x128xf32>
    %cst_13 = arith.constant dense<0.000000e+00> : vector<8x128xf32>
    %40 = tpu.matmul %38, %39, %cst_13 {dimension_numbers = #tpu.dot_dimension_numbers<[1], [0], [0], [1], [0, 0, 1, 1], [], []>} : vector<8x128xf32>, vector<128x128xf32>, vector<8x128xf32> -> vector<8x128xf32>
    %41 = vector.broadcast %5 : vector<1x128xf32> to vector<8x128xf32>
    %42 = arith.addf %40, %41 : vector<8x128xf32>
    %cst_14 = arith.constant dense<0.000000e+00> : vector<8xf32>
    %43 = vector.multi_reduction <add>, %42, %cst_14 [1] : vector<8x128xf32> to vector<8xf32>
    %44 = vector.shape_cast %43 : vector<8xf32> to vector<8x1xf32>
    %cst_15 = arith.constant 3.125000e-02 : f32
    %45 = vector.broadcast %cst_15 : f32 to vector<8x1xf32>
    %46 = arith.mulf %44, %45 : vector<8x1xf32>
    %47 = vector.broadcast %46 : vector<8x1xf32> to vector<8x128xf32>
    %48 = arith.subf %42, %47 : vector<8x128xf32>
    %49 = arith.mulf %48, %48 : vector<8x128xf32>
    %50 = vector.broadcast %9 : vector<1x128xf32> to vector<8x128xf32>
    %51 = arith.mulf %49, %50 : vector<8x128xf32>
    %cst_16 = arith.constant dense<0.000000e+00> : vector<8xf32>
    %52 = vector.multi_reduction <add>, %51, %cst_16 [1] : vector<8x128xf32> to vector<8xf32>
    %53 = vector.shape_cast %52 : vector<8xf32> to vector<8x1xf32>
    %cst_17 = arith.constant 0.0322580636 : f32
    %54 = vector.broadcast %cst_17 : f32 to vector<8x1xf32>
    %55 = arith.mulf %53, %54 : vector<8x1xf32>
    %56 = math.sqrt %55 : vector<8x1xf32>
    %cst_18 = arith.constant 9.99999974E-6 : f32
    %57 = vector.broadcast %cst_18 : f32 to vector<8x1xf32>
    %58 = arith.addf %56, %57 : vector<8x1xf32>
    %59 = tpu.reciprocal %58 : vector<8x1xf32> -> vector<8x1xf32>
    %60 = vector.broadcast %59 : vector<8x1xf32> to vector<8x128xf32>
    %61 = arith.mulf %48, %60 : vector<8x128xf32>
    %62 = vector.broadcast %6 : vector<1x128xf32> to vector<8x128xf32>
    %63 = arith.mulf %62, %61 : vector<8x128xf32>
    %64 = vector.broadcast %7 : vector<1x128xf32> to vector<8x128xf32>
    %65 = arith.addf %63, %64 : vector<8x128xf32>
    %cst_19 = arith.constant 0.000000e+00 : f32
    %66 = vector.broadcast %cst_19 : f32 to vector<8x128xf32>
    %67 = arith.maximumf %65, %66 : vector<8x128xf32>
    %c0_20 = arith.constant 0 : index
    %c0_21 = arith.constant 0 : index
    %68 = vector.load %arg4[%c0_20, %c0_21] : memref<128x128xf32, #tpu.memory_space<vmem>>, vector<128x128xf32>
    %cst_22 = arith.constant dense<0.000000e+00> : vector<8x128xf32>
    %69 = tpu.matmul %67, %68, %cst_22 {dimension_numbers = #tpu.dot_dimension_numbers<[1], [0], [0], [1], [0, 0, 1, 1], [], []>} : vector<8x128xf32>, vector<128x128xf32>, vector<8x128xf32> -> vector<8x128xf32>
    %70 = vector.broadcast %8 : vector<1x128xf32> to vector<8x128xf32>
    %71 = arith.addf %69, %70 : vector<8x128xf32>
    %72 = math.tanh %71 : vector<8x128xf32>
    %c0_23 = arith.constant 0 : index
    %c0_24 = arith.constant 0 : index
    %73 = vector.load %arg6[%c0_23, %c0_24] : memref<8x128xf32, #tpu.memory_space<vmem>>, vector<8x128xf32>
    tpu.vector_store %arg6[%c0_23, %c0_24], %72 {strides = array<i32>} : memref<8x128xf32, #tpu.memory_space<vmem>>, vector<8x128xf32>,
    return
  }
  func.func @transform_0(%arg0: i32) -> (i32, i32) {
    %c0_i32 = arith.constant 0 : i32
    %c0_i32_0 = arith.constant 0 : i32
    return %arg0, %c0_i32 : i32, i32
  }
  func.func @transform_1(%arg0: i32) -> (i32, i32) {
    %c0_i32 = arith.constant 0 : i32
    %c0_i32_0 = arith.constant 0 : i32
    %c0_i32_1 = arith.constant 0 : i32
    return %c0_i32, %c0_i32_0 : i32, i32
  }
  func.func @transform_2(%arg0: i32) -> (i32, i32) {
    %c0_i32 = arith.constant 0 : i32
    %c0_i32_0 = arith.constant 0 : i32
    %c0_i32_1 = arith.constant 0 : i32
    return %c0_i32, %c0_i32_0 : i32, i32
  }
  func.func @transform_3(%arg0: i32) -> (i32, i32) {
    %c0_i32 = arith.constant 0 : i32
    %c0_i32_0 = arith.constant 0 : i32
    %c0_i32_1 = arith.constant 0 : i32
    return %c0_i32, %c0_i32_0 : i32, i32
  }
  func.func @transform_4(%arg0: i32) -> (i32, i32) {
    %c0_i32 = arith.constant 0 : i32
    %c0_i32_0 = arith.constant 0 : i32
    %c0_i32_1 = arith.constant 0 : i32
    return %c0_i32, %c0_i32_0 : i32, i32
  }
  func.func @transform_5(%arg0: i32) -> (i32, i32) {
    %c0_i32 = arith.constant 0 : i32
    %c0_i32_0 = arith.constant 0 : i32
    return %arg0, %c0_i32 : i32, i32
  }
}

</mosaic_0001>

<bundles_post_ra>
// kernel: actor_forward.1
= control target key start
LH: loop header
LB: loop body
LE: loop exit
PB: predicated region body
PF: predicated region fallthrough
CT: control target
= control target key end

     0   :  { %s910_s18 = smov 0   ;;  %s1136_s0 = inlined_call_operand.vmem [shape: f32[16,128], index: 0, kind: input, shape index: {}]   ;;  %s1137_s1 = inlined_call_operand.vmem [shape: f32[128,128], index: 1, kind: input, shape index: {}]   ;;  %s1138_s2 = inlined_call_operand.vmem [shape: f32[128,128], index: 2, kind: input, shape index: {}]   ;;  %s1139_s3 = inlined_call_operand.vmem [shape: f32[128,128], index: 3, kind: input, shape index: {}]   ;;  %s1140_s4 = inlined_call_operand.vmem [shape: f32[8,128], index: 4, kind: input, shape index: {}]   ;;  %s1141_s5 = inlined_call_operand.vmem [shape: f32[16,128], index: 5, kind: output, shape index: {}]  }
   0x1 LB: > { %s611_s19 = sadd.s32 4294967295, %s875_s18   ;;  %p615_p0 = scmp.ge.s32.totalorder %s875_s18, 1  ;;  %s875_s18 = sphi %s910_s18, %s15_s18  }
   0x2   : > { %p186_p1 = scmp.lt.s32.totalorder %s875_s18, 3 }
   0x4   : > { %p187_p2 = pnand %p615_p0, %p186_p1 }
   0x5   : > { %v222_v0 = vld [vmem:[%s1137_s1] sm:$0xff] (!%p187_p2)  ;;  %v223_v1 = vld [vmem:[%s1137_s1 + $0x8] sm:$0xff] (!%p187_p2)  ;;  %v224_v2 = vld [vmem:[%s1137_s1 + $0x10] sm:$0xff] (!%p187_p2)  ;;  %v877_v3 = vmov (!%p187_p2), 0.0|0.0   ;;  %vm878_vm0 = vmmov (!%p187_p2), 0   ;;  %v879_v6 = vmov (!%p187_p2), 0.0   ;;  %v238_v27 = vlaneseq (!%p187_p2) }
   0x6   : > { %190 = sbr.rel (%p187_p2) target bundleno = 1353 (0x549), region = 40  ;;  %776 = vmatprep.subr.bf16.mxu0 (!%p187_p2), %v877_v3  ;;  %v777_v4 = vpack.c.bf16 (!%p187_p2), %v223_v1, %v222_v0  ;;  %v225_v5 = vld [vmem:[%s1137_s1 + $0x18] sm:$0xff] (!%p187_p2)  ;;  %703 = vmatprep.mubr.msk.f32.mxu0 (!%p187_p2), %vm878_vm0, %v879_v6  ;;  %v226_v8 = vld [vmem:[%s1137_s1 + $0x20] sm:$0xff] (!%p187_p2)  ;;  %v227_v9 = vld [vmem:[%s1137_s1 + $0x28] sm:$0xff] (!%p187_p2)  ;;  %p212_p3 = scmp.lt.s32.totalorder (!%p187_p2), %s611_s19, 1 }
   0x7   : > { %800 = vmatprep.subr.bf16.mxu1 (!%p187_p2), %v877_v3  ;;  %738 = vmatprep.mubr.msk.f32.mxu1 (!%p187_p2), %vm878_vm0, %v879_v6  ;;  %v780_v7 = vpack.c.bf16 (!%p187_p2), %v225_v5, %v224_v2  ;;  %v783_v10 = vpack.c.bf16 (!%p187_p2), %v227_v9, %v226_v8  ;;  %v228_v11 = vld [vmem:[%s1137_s1 + $0x30] sm:$0xff] (!%p187_p2)  ;;  %v229_v12 = vld [vmem:[%s1137_s1 + $0x38] sm:$0xff] (!%p187_p2)  ;;  %v230_v14 = vld [vmem:[%s1137_s1 + $0x40] sm:$0xff] (!%p187_p2)  ;;  %v991_v28 = vshrl.u32 (!%p187_p2), %v238_v27, 7 }
   0x8   : > { %778 = vmatpush3.bf16.msra.mxu0 (!%p187_p2), %v777_v4  ;;  %v786_v13 = vpack.c.bf16 (!%p187_p2), %v229_v12, %v228_v11  ;;  %v231_v15 = vld [vmem:[%s1137_s1 + $0x48] sm:$0xff] (!%p187_p2)  ;;  %v232_v17 = vld [vmem:[%s1137_s1 + $0x50] sm:$0xff] (!%p187_p2)  ;;  %v233_v18 = vld [vmem:[%s1137_s1 + $0x58] sm:$0xff] (!%p187_p2) }
   0x9   : > { %779 = vmatprep.subr.bf16.mxu0 (!%p187_p2), %v877_v3  ;;  %v789_v16 = vpack.c.bf16 (!%p187_p2), %v231_v15, %v230_v14  ;;  %v792_v19 = vpack.c.bf16 (!%p187_p2), %v233_v18, %v232_v17  ;;  %v234_v20 = vld [vmem:[%s1137_s1 + $0x60] sm:$0xff] (!%p187_p2)  ;;  %v235_v21 = vld [vmem:[%s1137_s1 + $0x68] sm:$0xff] (!%p187_p2)  ;;  %v236_v23 = vld [vmem:[%s1137_s1 + $0x70] sm:$0xff] (!%p187_p2)  ;;  %v240_v29 = vsub.s32 (!%p187_p2), 0, %v991_v28  ;;  %v319_v35 = vsub.s32 (!%p187_p2), 7, %v991_v28 }
   0xa   : > { %v795_v22 = vpack.c.bf16 (!%p187_p2), %v235_v21, %v234_v20  ;;  %v237_v24 = vld [vmem:[%s1137_s1 + $0x78] sm:$0xff] (!%p187_p2)  ;;  %v997_v30 = vld [vmem:[%s1140_s4] sm:$0xff] (!%p187_p2)  ;;  %v347_v43 = vld [vmem:[%s1138_s2 + $0x8] sm:$0xff] (!%p187_p2)  ;;  %v337_v11 = vsub.s32 (!%p187_p2), 1, %v991_v28  ;;  %v342_v12 = vsub.s32 (!%p187_p2), 2, %v991_v28  ;;  %v364_v20 = vsub.s32 (!%p187_p2), 3, %v991_v28 }
   0xb   : > { %v798_v25 = vpack.c.bf16 (!%p187_p2), %v237_v24, %v236_v23  ;;  %v241_v31 = vrot.slane (!%p187_p2), %v997_v30, %v240_v29  ;;  %v1002_v39 = vrot.slane (!%p187_p2), %v997_v30, %v319_v35  ;;  %v346_v42 = vld [vmem:[%s1138_s2] sm:$0xff] (!%p187_p2)  ;;  %v348_v45 = vld [vmem:[%s1138_s2 + $0x10] sm:$0xff] (!%p187_p2)  ;;  %v349_v46 = vld [vmem:[%s1138_s2 + $0x18] sm:$0xff] (!%p187_p2) }
   0xc   : > { %781 = vmatpush3.bf16.msra.mxu0 (!%p187_p2), %v780_v7  ;;  %v801_v44 = vpack.c.bf16 (!%p187_p2), %v347_v43, %v346_v42  ;;  %v804_v47 = vpack.c.bf16 (!%p187_p2), %v349_v46, %v348_v45  ;;  %v350_v48 = vld [vmem:[%s1138_s2 + $0x20] sm:$0xff] (!%p187_p2)  ;;  %v351_v49 = vld [vmem:[%s1138_s2 + $0x28] sm:$0xff] (!%p187_p2)  ;;  %v352_v51 = vld [vmem:[%s1138_s2 + $0x30] sm:$0xff] (!%p187_p2)  ;;  %v365_v21 = vrot.slane (!%p187_p2), %v997_v30, %v364_v20 }
   0xd   : > { %782 = vmatprep.subr.bf16.mxu0 %v877_v3  ;;  %s1143_s19 = smov (!%p212_p3, %s611_s19), 1  ;;  %v807_v50 = vpack.c.bf16 %v351_v49, %v350_v48  ;;  %v353_v52 = vld [vmem:[%s1138_s2 + $0x38] sm:$0xff]  ;;  %v354_v53 = vld [vmem:[%s1138_s2 + $0x40] sm:$0xff]  ;;  %v355_v55 = vld [vmem:[%s1138_s2 + $0x48] sm:$0xff] }
   0xe   : > { %s616_s29 = sshll.u32 %s1143_s19, 3  ;;  %802 = vmatpush3.bf16.msra.mxu1 %v801_v44  ;;  %v810_v54 = vpack.c.bf16 %v353_v52, %v352_v51  ;;  %v813_v56 = vpack.c.bf16 %v355_v55, %v354_v53  ;;  %v356_v57 = vld [vmem:[%s1138_s2 + $0x50] sm:$0xff]  ;;  %v357_v58 = vld [vmem:[%s1138_s2 + $0x58] sm:$0xff]  ;;  %v358_v60 = vld [vmem:[%s1138_s2 + $0x60] sm:$0xff] }
   0xf   : > { %s215_s7 = scalar_lea.vmem %s1136_s0, %s616_s29  ;;  %803 = vmatprep.subr.bf16.mxu1 %v877_v3  ;;  %v816_v59 = vpack.c.bf16 %v357_v58, %v356_v57  ;;  %v359_v61 = vld [vmem:[%s1138_s2 + $0x68] sm:$0xff]  ;;  %v360_v63 = vld [vmem:[%s1138_s2 + $0x70] sm:$0xff]  ;;  %v361_v0 = vld [vmem:[%s1138_s2 + $0x78] sm:$0xff]  ;;  %s219_s10 = scalar_lea.vmem %s1141_s5, %s616_s29 }
  0x10   : > { %784 = vmatpush3.bf16.msra.mxu0 %v783_v10  ;;  %v220_v26 = vld [vmem:[%s215_s7] sm:$0xff]  ;;  %v819_v62 = vpack.c.bf16 %v359_v61, %v358_v60  ;;  %v822_v1 = vpack.c.bf16 %v361_v0, %v360_v63  ;;  %v468_v35 = vld [vmem:[%s1139_s3 + $0x10] sm:$0xff]  ;;  %v473_v42 = vld [vmem:[%s1139_s3 + $0x38] sm:$0xff]  ;;  %v457_v0 = vsub.s32 4, %v991_v28 }
  0x11   : > { %785 = vmatprep.subr.bf16.mxu0 %v877_v3  ;;  %v474_v44 = vld [vmem:[%s1139_s3 + $0x40] sm:$0xff]  ;;  %v475_v45 = vld [vmem:[%s1139_s3 + $0x48] sm:$0xff]  ;;  %v477_v48 = vld [vmem:[%s1139_s3 + $0x58] sm:$0xff] }
  0x12   : > { %805 = vmatpush3.bf16.msra.mxu1 %v804_v47  ;;  %v837_v46 = vpack.c.bf16 %v475_v45, %v474_v44  ;;  %v476_v47 = vld [vmem:[%s1139_s3 + $0x50] sm:$0xff]  ;;  %v479_v51 = vld [vmem:[%s1139_s3 + $0x68] sm:$0xff] }
  0x13   : > { %806 = vmatprep.subr.bf16.mxu1 %v877_v3  ;;  %v840_v49 = vpack.c.bf16 %v477_v48, %v476_v47  ;;  %v480_v53 = vld [vmem:[%s1139_s3 + $0x70] sm:$0xff] }
  0x14   : > { %787 = vmatpush3.bf16.msra.mxu0 %v786_v13  ;;  %v338_v13 = vrot.slane %v997_v30, %v337_v11 }
  0x15   : > { %788 = vmatprep.subr.bf16.mxu0 %v877_v3 }
  0x16   : > { %808 = vmatpush3.bf16.msra.mxu1 %v807_v50  ;;  %v478_v50 = vld [vmem:[%s1139_s3 + $0x60] sm:$0xff] }
  0x17   : > { %809 = vmatprep.subr.bf16.mxu1 %v877_v3  ;;  %v843_v52 = vpack.c.bf16 %v479_v51, %v478_v50 }
  0x18   : > { %790 = vmatpush3.bf16.msra.mxu0 %v789_v16  ;;  %v343_v16 = vrot.slane %v997_v30, %v342_v12 }
  0x19   : > { %791 = vmatprep.subr.bf16.mxu0 %v877_v3 }
  0x1a   : > { %811 = vmatpush3.bf16.msra.mxu1 %v810_v54  ;;  %v481_v54 = vld [vmem:[%s1139_s3 + $0x78] sm:$0xff] }
  0x1b   : > { %812 = vmatprep.subr.bf16.mxu1 %v877_v3  ;;  %v846_v55 = vpack.c.bf16 %v481_v54, %v480_v53 }
  0x1c   : > { %793 = vmatpush3.bf16.msra.mxu0 %v792_v19 }
  0x1d   : > { %794 = vmatprep.subr.bf16.mxu0 %v877_v3 }
  0x1e   : > { %814 = vmatpush3.bf16.msra.mxu1 %v813_v56 }
  0x1f   : > { %815 = vmatprep.subr.bf16.mxu1 %v877_v3 }
  0x20   : > { %796 = vmatpush3.bf16.msra.mxu0 %v795_v22 }
  0x21   : > { %797 = vmatprep.subr.bf16.mxu0 %v877_v3 }
  0x22   : > { %817 = vmatpush3.bf16.msra.mxu1 %v816_v59 }
  0x23   : > { %818 = vmatprep.subr.bf16.mxu1 %v877_v3 }
  0x24   : > { %799 = vmatpush3.bf16.msra.mxu0 %v798_v25 }
  0x25   : > { %824 = vmatprep.subr.bf16.mxu0 %v877_v3 }
  0x26   : > { %820 = vmatpush3.bf16.msra.mxu1 %v819_v62 }
  0x27   : > { %704 = vmatmul.mubr.f32.vlgmr.msra.gmra.mrb[0].mxu0 %v220_v26  ;;  %821 = vmatprep.subr.bf16.mxu1 %v877_v3 }
  0x28   : > { %773 = vmatprep.mubr.msk.f32.mxu0 %vm878_vm0, %v879_v6 }
  0x2a   : > { %823 = vmatpush3.bf16.msra.mxu1 %v822_v1  ;;  %v462_v1 = vsub.s32 5, %v991_v28 }
  0xfa   : > { %v308_v32 = vpop.f32.mrb[0].mxu0 }
  0xfb   : > { %v309_v33 = vadd.f32 %v308_v32, %v241_v31  ;;  %v705_v34 = vpop.f32.mrb[1].mxu0  ;;  %v466_v32 = vld [vmem:[%s1139_s3] sm:$0xff] }
  0xfd   : > { %312 = vadd.xlane.f32.xlu0 %v309_v33 }
 0x18a   : > { %v313_v36 = vpop.xlane.xlu0 %312 }
 0x18b   : > { %v314_v37 = vmul.f32 0.03125, %v313_v36  ;;  %v469_v36 = vld [vmem:[%s1139_s3 + $0x18] sm:$0xff] }
 0x18d   : > { %v315_v38 = vsub.f32 %v309_v33, %v314_v37  ;;  %v467_v33 = vld [vmem:[%s1139_s3 + $0x8] sm:$0xff]  ;;  %v828_v37 = vpack.c.bf16 %v469_v36, %v468_v35 }
 0x18e   : > { %v825_v34 = vpack.c.bf16 %v467_v33, %v466_v32 }
 0x18f   : > { %v316_v40 = vmul.f32 %v315_v38, %v315_v38 }
 0x190   : > { %826 = vmatpush3.bf16.msra.mxu0 %v825_v34 }
 0x191   : > { %v321_v41 = vmul.f32 %v1002_v39, %v316_v40  ;;  %827 = vmatprep.subr.bf16.mxu0 %v877_v3 }
 0x193   : > { %322 = vadd.xlane.f32.xlu0 %v321_v41  ;;  %v472_v41 = vld [vmem:[%s1139_s3 + $0x30] sm:$0xff] }
 0x194   : > { %829 = vmatpush3.bf16.msra.mxu0 %v828_v37  ;;  %v834_v43 = vpack.c.bf16 %v473_v42, %v472_v41 }
 0x195   : > { %830 = vmatprep.subr.bf16.mxu0 %v877_v3 }
 0x220   : > { %v323_v2 = vpop.xlane.xlu0 %322 }
 0x221   : > { %v324_v4 = vmul.f32 0.032258064, %v323_v2 }
 0x223   : > { %859 = vrsqrt.f32 %v324_v4  ;;  %vm327_vm1 = vcmp.eq.f32.partialorder %v324_v4, inf  ;;  %v330_v7 = vand.u32 2147483648, %v324_v4  ;;  %vm329_vm2 = vcmp.eq.f32.partialorder %v324_v4, 0.0 }
 0x22d   : > { %v860_v5 = vpop.eup %859 }
 0x22e   : > { %v326_v6 = vmul.f32 %v860_v5, %v324_v4  ;;  %v463_v5 = vrot.slane %v997_v30, %v462_v1 }
 0x230   : > { %v328_v8 = vsel %vm327_vm1, %v324_v4, %v326_v6 }
 0x231   : > { %v331_v9 = vsel %vm329_vm2, %v330_v7, %v328_v8 }
 0x232   : > { %v332_v10 = vadd.f32 1e-05, %v331_v9  ;;  %v484_v9 = vsub.s32 6, %v991_v28 }
 0x234   : > { %861 = vrcp.f32 %v332_v10  ;;  %v485_v10 = vrot.slane %v997_v30, %v484_v9 }
 0x23e   : > { %v862_v14 = vpop.eup %861 }
 0x23f   : > { %v334_v15 = vmul.f32 %v862_v14, %v315_v38  ;;  %v470_v38 = vld [vmem:[%s1139_s3 + $0x20] sm:$0xff] }
 0x241   : > { %v339_v17 = vmul.f32 %v338_v13, %v334_v15 }
 0x243   : > { %v344_v18 = vadd.f32 %v343_v16, %v339_v17 }
 0x245   : > { %v345_v19 = vmax.f32 %v344_v18, 0.0 }
 0x247   : > { %739 = vmatmul.mubr.f32.vlgmr.msra.gmra.mrb[0].mxu1 %v345_v19 }
 0x31a   : > { %v432_v22 = vpop.f32.mrb[0].mxu1 }
 0x31b   : > { %v433_v23 = vadd.f32 %v432_v22, %v365_v21  ;;  %v740_v24 = vpop.f32.mrb[1].mxu1 }
 0x31d   : > { %436 = vadd.xlane.f32.xlu1 %v433_v23 }
 0x3aa   : > { %v437_v25 = vpop.xlane.xlu1 %436 }
 0x3ab   : > { %v438_v26 = vmul.f32 0.03125, %v437_v25 }
 0x3ad   : > { %v439_v27 = vsub.f32 %v433_v23, %v438_v26 }
 0x3af   : > { %v440_v29 = vmul.f32 %v439_v27, %v439_v27 }
 0x3b1   : > { %v441_v31 = vmul.f32 %v440_v29, %v1002_v39  ;;  %v471_v39 = vld [vmem:[%s1139_s3 + $0x28] sm:$0xff] }
 0x3b2   : > { %v831_v40 = vpack.c.bf16 %v471_v39, %v470_v38 }
 0x3b3   : > { %442 = vadd.xlane.f32.xlu1 %v441_v31 }
 0x3b4   : > { %832 = vmatpush3.bf16.msra.mxu0 %v831_v40 }
 0x3b5   : > { %833 = vmatprep.subr.bf16.mxu0 %v877_v3 }
 0x3b8   : > { %835 = vmatpush3.bf16.msra.mxu0 %v834_v43 }
 0x3b9   : > { %836 = vmatprep.subr.bf16.mxu0 %v877_v3 }
 0x3bc   : > { %838 = vmatpush3.bf16.msra.mxu0 %v837_v46 }
 0x3bd   : > { %839 = vmatprep.subr.bf16.mxu0 %v877_v3 }
 0x3c0   : > { %841 = vmatpush3.bf16.msra.mxu0 %v840_v49 }
 0x3c1   : > { %842 = vmatprep.subr.bf16.mxu0 %v877_v3 }
 0x3c4   : > { %844 = vmatpush3.bf16.msra.mxu0 %v843_v52 }
 0x3c5   : > { %845 = vmatprep.subr.bf16.mxu0 %v877_v3  ;;  %v458_v3 = vrot.slane %v997_v30, %v457_v0 }
 0x3c8   : > { %847 = vmatpush3.bf16.msra.mxu0 %v846_v55 }
 0x440   : > { %v443_v56 = vpop.xlane.xlu1 %442 }
 0x441   : > { %v444_v57 = vmul.f32 0.032258064, %v443_v56 }
 0x443   : > { %863 = vrsqrt.f32 %v444_v57  ;;  %vm447_vm3 = vcmp.eq.f32.partialorder %v444_v57, inf  ;;  %v450_v60 = vand.u32 2147483648, %v444_v57  ;;  %vm449_vm4 = vcmp.eq.f32.partialorder %v444_v57, 0.0 }
 0x44d   : > { %v864_v58 = vpop.eup %863 }
 0x44e   : > { %v446_v59 = vmul.f32 %v864_v58, %v444_v57 }
 0x450   : > { %v448_v61 = vsel %vm447_vm3, %v444_v57, %v446_v59 }
 0x451   : > { %v451_v62 = vsel %vm449_vm4, %v450_v60, %v448_v61 }
 0x452   : > { %v452_v63 = vadd.f32 1e-05, %v451_v62 }
 0x454   : > { %865 = vrcp.f32 %v452_v63 }
 0x45e   : > { %v866_v2 = vpop.eup %865 }
 0x45f   : > { %v454_v4 = vmul.f32 %v866_v2, %v439_v27 }
 0x461   : > { %v459_v6 = vmul.f32 %v458_v3, %v454_v4 }
 0x463   : > { %v464_v7 = vadd.f32 %v463_v5, %v459_v6 }
 0x465   : > { %v465_v8 = vmax.f32 %v464_v7, 0.0 }
 0x467   : > { %774 = vmatmul.mubr.f32.vlgmr.msra.gmra.mrb[2].mxu0 %v465_v8 }
 0x53a   : > { %v552_v11 = vpop.f32.mrb[2].mxu0 }
 0x53b   : > { %v553_v12 = vadd.f32 %v552_v11, %v485_v10  ;;  %v775_v13 = vpop.f32.mrb[3].mxu0 }
 0x53d   : > { %867 = vtanh.f32 %v553_v12 }
 0x547   : > { %v868_v14 = vpop.eup %867 }
 0x548   : > { %557 = vst [vmem:[%s219_s10] sm:$0xff] %v868_v14 }
 0x549 PF: > { %s15_s18 = sadd.s32 1, %s875_s18  }
 0x54a   : > { %p12_p4 = scmp.ge.s32.totalorder %s15_s18, 4  }
 0x54c   :  { %14 = sbr.rel (!%p12_p4) target bundleno = 1 (0x1), region = 70 }

</bundles_post_ra>
